<compile_context>
chip_gen: v7x
topology: tpu7x:2x2x1
jax: 0.10.0
libtpu: 0.0.40
codegen_flags: <defaults>
</compile_context>

<pallas_src>
import functools

import jax
import jax.numpy as jnp
from jax.experimental import pallas as pl
from jax.experimental.pallas import tpu as pltpu

LANE = 128
MAX_BLOCK_B = 1024  # single-step up to this batch; beyond, grid >= 2 (v7x TCs)


def _round_up(n, m):
    return ((n + m - 1) // m) * m


def mlp_kernel(x_ref, w1_ref, b1_ref, w2_ref, b2_ref, out_ref):
    # x arrives as f32; cast to bf16 in-kernel (VPU work hidden under the MXU).
    x = x_ref[...].astype(jnp.bfloat16)
    # layer1: Linear(input -> hidden_pad) + ReLU. bf16 MXU, f32 accumulate,
    # f32 bias+ReLU epilogue (VPU-safe on v5e).
    h = jnp.dot(x, w1_ref[...], preferred_element_type=jnp.float32)
    h = jnp.maximum(h + b1_ref[...], 0.0)
    # layer2: Linear(hidden_pad -> out_pad); second MXU pass, f32 accumulate,
    # lane-dense bf16 store (halves the output HBM stream).
    o = jnp.dot(h.astype(w2_ref.dtype), w2_ref[...],
                preferred_element_type=jnp.float32)
    out_ref[...] = (o + b2_ref[...]).astype(out_ref.dtype)


def prepare_params(w1, b1, w2, b2):
    """Pad feature dims to 128 lanes and cast weights to bf16, ONCE.

    Call at init (and after every weight update), then reuse the slabs for
    every forward call — removes 4 pad/cast XLA ops from the hot path.
    w1: (K, H), b1: (H,)/(1, H), w2: (H, O), b2: (O,)/(1, O).
    """
    K, H = w1.shape
    H2, O = w2.shape
    assert H2 == H
    Hp = _round_up(H, LANE)
    Op = _round_up(O, LANE)
    w1p = jnp.zeros((K, Hp), jnp.bfloat16).at[:, :H].set(w1.astype(jnp.bfloat16))
    b1p = jnp.zeros((1, Hp), jnp.float32).at[:, :H].set(jnp.reshape(b1, (1, H)))
    w2p = jnp.zeros((Hp, Op), jnp.bfloat16).at[:H, :O].set(w2.astype(jnp.bfloat16))
    b2p = jnp.zeros((1, Op), jnp.float32).at[:, :O].set(jnp.reshape(b2, (1, O)))
    return w1p, b1p, w2p, b2p


def _pick_block_b(B):
    # Small/typical RL batches: one grid step (per-step overhead dominates the
    # ~10 MFLOP workload).  Large batches: cap the block so grid >= 2 and the
    # "parallel" batch axis can shard across v7x's two TensorCores.
    return B if B <= MAX_BLOCK_B else MAX_BLOCK_B


def dqn_forward(x, w1p, b1p, w2p, b2p, *, out_dim, block_b=None):
    """relu(x @ w1 + b1) @ w2 + b2 on pre-padded weight slabs.

    x: (B, K) f32.  Returns (B, out_dim) f32.
    """
    B, K = x.shape
    Kw, Hp = w1p.shape
    Op = w2p.shape[1]
    assert Kw == K and b1p.shape == (1, Hp) and b2p.shape == (1, Op)

    if block_b is None:
        block_b = _pick_block_b(B)
    Bp = _round_up(B, block_b)
    # Skip the activation pad-copy whenever no batch padding is needed.
    xp = x if Bp == B else jnp.zeros((Bp, K), x.dtype).at[:B, :].set(x)

    grid = (Bp // block_b,)
    out_padded = pl.pallas_call(
        mlp_kernel,
        out_shape=jax.ShapeDtypeStruct((Bp, Op), jnp.bfloat16),
        grid=grid,
        in_specs=[
            # Activation stream: one (block_b, K) f32 tile per grid step.
            pl.BlockSpec((block_b, K), lambda i: (i, 0)),
            # Weights / biases: constant block index -> resident in VMEM.
            pl.BlockSpec((K, Hp), lambda i: (0, 0)),
            pl.BlockSpec((1, Hp), lambda i: (0, 0)),
            pl.BlockSpec((Hp, Op), lambda i: (0, 0)),
            pl.BlockSpec((1, Op), lambda i: (0, 0)),
        ],
        # Lane-dense (block_b, 128*k) bf16 output slab -> unmasked vst.
        out_specs=pl.BlockSpec((block_b, Op), lambda i: (i, 0)),
        compiler_params=pltpu.CompilerParams(
            dimension_semantics=("parallel",)),
    )(xp, w1p, b1p, w2p, b2p)
    # Slice the real Q-values and return f32 to match the PyTorch module.
    return out_padded[:B, :out_dim].astype(jnp.float32)


def init_params(key, input_dim, hidden_node, output_dim):
    """Deterministic init mimicking nn.Linear default (uniform +-1/sqrt(fan_in)).

    Weights are stored as (in_features, out_features) — the transpose of the
    PyTorch nn.Linear layout — so the kernel computes y = x @ W + b.
    """
    k1, k2, k3, k4 = jax.random.split(key, 4)
    bound1 = 1.0 / jnp.sqrt(input_dim)
    bound2 = 1.0 / jnp.sqrt(hidden_node)
    w1 = jax.random.uniform(k1, (input_dim, hidden_node), jnp.float32, -bound1, bound1)
    b1 = jax.random.uniform(k2, (1, hidden_node), jnp.float32, -bound1, bound1)
    w2 = jax.random.uniform(k3, (hidden_node, output_dim), jnp.float32, -bound2, bound2)
    b2 = jax.random.uniform(k4, (1, output_dim), jnp.float32, -bound2, bound2)
    return w1, b1, w2, b2


if __name__ == "__main__":
    key = jax.random.PRNGKey(0)
    # Small DQN-style MLP; batch=256 runs in a single grid step.
    batch, input_dim, hidden_node, output_dim = 256, 16, 32, 8

    k_x, k_p = jax.random.split(key)
    x = jax.random.normal(k_x, (batch, input_dim), jnp.float32)
    w1, b1, w2, b2 = init_params(k_p, input_dim, hidden_node, output_dim)

    # Pad / cast weights once (outside the hot loop).
    w1p, b1p, w2p, b2p = prepare_params(w1, b1, w2, b2)
    w1p, b1p, w2p, b2p = jax.block_until_ready((w1p, b1p, w2p, b2p))

    fwd = jax.jit(functools.partial(dqn_forward, out_dim=output_dim))
    out = fwd(x, w1p, b1p, w2p, b2p)
    jax.block_until_ready(out)
    assert out.shape == (batch, output_dim)

    # Reference 1: identical bf16-operand / f32-accumulate math in plain JAX
    # (validates the kernel); tolerance covers the bf16 output quantization.
    x_bf = x.astype(jnp.bfloat16)
    w1_bf = w1.astype(jnp.bfloat16)
    w2_bf = w2.astype(jnp.bfloat16)
    h_ref = jnp.maximum(
        jnp.dot(x_bf, w1_bf, preferred_element_type=jnp.float32) + b1, 0.0)
    ref_bf16 = jnp.dot(h_ref.astype(jnp.bfloat16), w2_bf,
                       preferred_element_type=jnp.float32) + b2
    assert jnp.allclose(out, ref_bf16, atol=1e-2, rtol=1e-2)

    # Reference 2: full-f32 PyTorch-equivalent math — loose tolerance for the
    # bf16 operand/output quantization.
    ref_f32 = jnp.maximum(x @ w1 + b1, 0.0) @ w2 + b2
    assert jnp.allclose(out, ref_f32, atol=5e-2, rtol=5e-2)

    print("KERNEL_OK")
</pallas_src>

<mosaic_0001>
module attributes {stable_mosaic.version = 11 : i64} {
  func.func @mlp_kernel(%arg0: i32, %arg1: memref<256x16xf32, #tpu.memory_space<vmem>>, %arg2: memref<16x128xbf16, #tpu.memory_space<vmem>>, %arg3: memref<1x128xf32, #tpu.memory_space<vmem>>, %arg4: memref<128x128xbf16, #tpu.memory_space<vmem>>, %arg5: memref<1x128xf32, #tpu.memory_space<vmem>>, %arg6: memref<256x128xbf16, #tpu.memory_space<vmem>>) attributes {dimension_semantics = [#tpu.dimension_semantics<parallel>], iteration_bounds = array<i64: 1>, scalar_prefetch = 0 : i64, scratch_operands = 0 : i64, tpu.core_type = #tpu.core_type<tc>, window_params = [{transform_indices = @transform_0, window_bounds = array<i64: 256, 16>}, {pipeline_mode = #tpu.pipeline_mode<synchronous>, transform_indices = @transform_1, window_bounds = array<i64: 16, 128>}, {pipeline_mode = #tpu.pipeline_mode<synchronous>, transform_indices = @transform_2, window_bounds = array<i64: 1, 128>}, {pipeline_mode = #tpu.pipeline_mode<synchronous>, transform_indices = @transform_3, window_bounds = array<i64: 128, 128>}, {pipeline_mode = #tpu.pipeline_mode<synchronous>, transform_indices = @transform_4, window_bounds = array<i64: 1, 128>}, {transform_indices = @transform_5, window_bounds = array<i64: 256, 128>}]} {
    %c0 = arith.constant 0 : index
    %c0_0 = arith.constant 0 : index
    %0 = vector.load %arg1[%c0, %c0_0] : memref<256x16xf32, #tpu.memory_space<vmem>>, vector<256x16xf32>
    %1 = arith.truncf %0 : vector<256x16xf32> to vector<256x16xbf16>
    %c0_1 = arith.constant 0 : index
    %c0_2 = arith.constant 0 : index
    %2 = vector.load %arg2[%c0_1, %c0_2] : memref<16x128xbf16, #tpu.memory_space<vmem>>, vector<16x128xbf16>
    %cst = arith.constant dense<0.000000e+00> : vector<256x128xf32>
    %3 = tpu.matmul %1, %2, %cst {dimension_numbers = #tpu.dot_dimension_numbers<[1], [0], [0], [1], [0, 0, 1, 1], [], []>} : vector<256x16xbf16>, vector<16x128xbf16>, vector<256x128xf32> -> vector<256x128xf32>
    %c0_3 = arith.constant 0 : index
    %c0_4 = arith.constant 0 : index
    %4 = vector.load %arg3[%c0_3, %c0_4] : memref<1x128xf32, #tpu.memory_space<vmem>>, vector<1x128xf32>
    %5 = vector.broadcast %4 : vector<1x128xf32> to vector<256x128xf32>
    %6 = arith.addf %3, %5 : vector<256x128xf32>
    %cst_5 = arith.constant 0.000000e+00 : f32
    %7 = vector.broadcast %cst_5 : f32 to vector<256x128xf32>
    %8 = arith.maximumf %6, %7 : vector<256x128xf32>
    %9 = arith.truncf %8 : vector<256x128xf32> to vector<256x128xbf16>
    %c0_6 = arith.constant 0 : index
    %c0_7 = arith.constant 0 : index
    %10 = vector.load %arg4[%c0_6, %c0_7] : memref<128x128xbf16, #tpu.memory_space<vmem>>, vector<128x128xbf16>
    %cst_8 = arith.constant dense<0.000000e+00> : vector<256x128xf32>
    %11 = tpu.matmul %9, %10, %cst_8 {dimension_numbers = #tpu.dot_dimension_numbers<[1], [0], [0], [1], [0, 0, 1, 1], [], []>} : vector<256x128xbf16>, vector<128x128xbf16>, vector<256x128xf32> -> vector<256x128xf32>
    %c0_9 = arith.constant 0 : index
    %c0_10 = arith.constant 0 : index
    %12 = vector.load %arg5[%c0_9, %c0_10] : memref<1x128xf32, #tpu.memory_space<vmem>>, vector<1x128xf32>
    %13 = vector.broadcast %12 : vector<1x128xf32> to vector<256x128xf32>
    %14 = arith.addf %11, %13 : vector<256x128xf32>
    %15 = arith.truncf %14 : vector<256x128xf32> to vector<256x128xbf16>
    %c0_11 = arith.constant 0 : index
    %c0_12 = arith.constant 0 : index
    %16 = vector.load %arg6[%c0_11, %c0_12] : memref<256x128xbf16, #tpu.memory_space<vmem>>, vector<256x128xbf16>
    tpu.vector_store %arg6[%c0_11, %c0_12], %15 {strides = array<i32>} : memref<256x128xbf16, #tpu.memory_space<vmem>>, vector<256x128xbf16>,
    return
  }
  func.func @transform_0(%arg0: i32) -> (i32, i32) {
    %c0_i32 = arith.constant 0 : i32
    %c0_i32_0 = arith.constant 0 : i32
    return %arg0, %c0_i32 : i32, i32
  }
  func.func @transform_1(%arg0: i32) -> (i32, i32) {
    %c0_i32 = arith.constant 0 : i32
    %c0_i32_0 = arith.constant 0 : i32
    %c0_i32_1 = arith.constant 0 : i32
    return %c0_i32, %c0_i32_0 : i32, i32
  }
  func.func @transform_2(%arg0: i32) -> (i32, i32) {
    %c0_i32 = arith.constant 0 : i32
    %c0_i32_0 = arith.constant 0 : i32
    %c0_i32_1 = arith.constant 0 : i32
    return %c0_i32, %c0_i32_0 : i32, i32
  }
  func.func @transform_3(%arg0: i32) -> (i32, i32) {
    %c0_i32 = arith.constant 0 : i32
    %c0_i32_0 = arith.constant 0 : i32
    %c0_i32_1 = arith.constant 0 : i32
    return %c0_i32, %c0_i32_0 : i32, i32
  }
  func.func @transform_4(%arg0: i32) -> (i32, i32) {
    %c0_i32 = arith.constant 0 : i32
    %c0_i32_0 = arith.constant 0 : i32
    %c0_i32_1 = arith.constant 0 : i32
    return %c0_i32, %c0_i32_0 : i32, i32
  }
  func.func @transform_5(%arg0: i32) -> (i32, i32) {
    %c0_i32 = arith.constant 0 : i32
    %c0_i32_0 = arith.constant 0 : i32
    return %arg0, %c0_i32 : i32, i32
  }
}

</mosaic_0001>

<bundles_post_ra>
// kernel: dqn_forward.1
= control target key start
LH: loop header
LB: loop body
LE: loop exit
PB: predicated region body
PF: predicated region fallthrough
CT: control target
= control target key end

     0   :  { %vm84_vm0 = vcmask 130048   ;;  %s1363_s1 = inlined_call_operand.vmem [shape: bf16[16,128], index: 1, kind: input, shape index: {}]   ;;  %s1364_s0 = inlined_call_operand.vmem [shape: f32[256,16], index: 0, kind: input, shape index: {}]   ;;  %s1365_s3 = inlined_call_operand.vmem [shape: bf16[128,128], index: 3, kind: input, shape index: {}]   ;;  %s1366_s2 = inlined_call_operand.vmem [shape: f32[1,128], index: 2, kind: input, shape index: {}]   ;;  %s1367_s4 = inlined_call_operand.vmem [shape: f32[1,128], index: 4, kind: input, shape index: {}]   ;;  %s1368_s5 = inlined_call_operand.vmem [shape: bf16[256,128], index: 5, kind: output, shape index: {}]  }
   0x1   :  { %v1063_v0 = vld [vmem:[%s1363_s1] sm:$0xff]   ;;  %v22_v2 = vld [vmem:[%s1364_s0 + $0x8] sm:$0xff]  ;;  %v23_v3 = vld [vmem:[%s1364_s0 + $0x10] sm:$0xff] }
   0x2   :  { %v21_v1 = vld [vmem:[%s1364_s0] sm:$0xff]  ;;  %965 = vmatprep.subr.bf16.mxu0 %v1063_v0  ;;  %v24_v5 = vld [vmem:[%s1364_s0 + $0x18] sm:$0xff]  ;;  %v26_v7 = vld [vmem:[%s1364_s0 + $0x28] sm:$0xff] }
   0x3   :  { %v53_v4 = vpack.c.bf16 %v22_v2, %v21_v1  ;;  %v25_v6 = vld [vmem:[%s1364_s0 + $0x20] sm:$0xff]  ;;  %966 = vmatpush3.bf16.msra.mxu0 %v1063_v0  ;;  %v54_v8 = vpack.c.bf16 %v24_v5, %v23_v3  ;;  %v27_v10 = vld [vmem:[%s1364_s0 + $0x30] sm:$0xff]  ;;  %v28_v11 = vld [vmem:[%s1364_s0 + $0x38] sm:$0xff] }
   0x4   :  { %v55_v9 = vpack.c.bf16 %v26_v7, %v25_v6  ;;  %v29_v12 = vld [vmem:[%s1364_s0 + $0x40] sm:$0xff]  ;;  %v30_v13 = vld [vmem:[%s1364_s0 + $0x48] sm:$0xff]  ;;  %v56_v14 = vpack.c.bf16 %v28_v11, %v27_v10  ;;  %v31_v17 = vld [vmem:[%s1364_s0 + $0x50] sm:$0xff] }
   0x5   :  { %967 = vmatprep.mubr.msk.bf16.mxu0 %vm84_vm0, %v53_v4  ;;  %v57_v15 = vpack.c.bf16 %v30_v13, %v29_v12  ;;  %v1064_v16 = vld [vmem:[%s1365_s3] sm:$0xff]   ;;  %v32_v18 = vld [vmem:[%s1364_s0 + $0x58] sm:$0xff]  ;;  %v1065_v19 = vld [vmem:[%s1365_s3 + $0x8] sm:$0xff]  }
   0x6   :  { %968 = vmatmul.mubr.msk.bf16.vlgmr.msra.gmra.mrb[0].mxu0 %vm84_vm0, %v54_v8  ;;  %v33_v20 = vld [vmem:[%s1364_s0 + $0x60] sm:$0xff]  ;;  %999 = vmatprep.subr.bf16.mxu0 %v1064_v16  ;;  %v34_v21 = vld [vmem:[%s1364_s0 + $0x68] sm:$0xff]  ;;  %v1066_v22 = vld [vmem:[%s1365_s3 + $0x10] sm:$0xff]   ;;  %v58_v23 = vpack.c.bf16 %v32_v18, %v31_v17 }
   0x7   :  { %971 = vmatprep.mubr.msk.bf16.mxu0 %vm84_vm0, %v55_v9  ;;  %1000 = vmatpush3.bf16.msra.mxu0 %v1064_v16  ;;  %v59_v24 = vpack.c.bf16 %v34_v21, %v33_v20  ;;  %v1067_v25 = vld [vmem:[%s1365_s3 + $0x18] sm:$0xff]   ;;  %v35_v26 = vld [vmem:[%s1364_s0 + $0x70] sm:$0xff]  ;;  %v37_v28 = vld [vmem:[%s1364_s0 + $0x80] sm:$0xff] }
   0x8   :  { %1001 = vmatprep.subr.bf16.mxu0 %v1065_v19  ;;  %1047 = vmatprep.subr.bf16.mxu1 %v1064_v16  ;;  %v36_v27 = vld [vmem:[%s1364_s0 + $0x78] sm:$0xff]  ;;  %v38_v29 = vld [vmem:[%s1364_s0 + $0x88] sm:$0xff]  ;;  %v1068_v30 = vld [vmem:[%s1365_s3 + $0x20] sm:$0xff]  }
   0x9   :  { %1055 = vmatpush3.bf16.msra.mxu1 %v1064_v16  ;;  %v60_v31 = vpack.c.bf16 %v36_v27, %v35_v26  ;;  %v61_v32 = vpack.c.bf16 %v38_v29, %v37_v28  ;;  %v1069_v33 = vld [vmem:[%s1365_s3 + $0x28] sm:$0xff]   ;;  %v39_v34 = vld [vmem:[%s1364_s0 + $0x90] sm:$0xff]  ;;  %v40_v35 = vld [vmem:[%s1364_s0 + $0x98] sm:$0xff] }
   0xa   :  { %1048 = vmatprep.subr.bf16.mxu1 %v1065_v19  ;;  %v41_v36 = vld [vmem:[%s1364_s0 + $0xa0] sm:$0xff]  ;;  %v42_v37 = vld [vmem:[%s1364_s0 + $0xa8] sm:$0xff]  ;;  %v62_v38 = vpack.c.bf16 %v40_v35, %v39_v34  ;;  %v43_v40 = vld [vmem:[%s1364_s0 + $0xb0] sm:$0xff] }
   0xb   :  { %1002 = vmatpush3.bf16.msra.mxu0 %v1065_v19  ;;  %v63_v39 = vpack.c.bf16 %v42_v37, %v41_v36  ;;  %v44_v41 = vld [vmem:[%s1364_s0 + $0xb8] sm:$0xff]  ;;  %v45_v42 = vld [vmem:[%s1364_s0 + $0xc0] sm:$0xff]  ;;  %v46_v43 = vld [vmem:[%s1364_s0 + $0xc8] sm:$0xff] }
   0xc   :  { %1003 = vmatprep.subr.bf16.mxu0 %v1066_v22  ;;  %v64_v44 = vpack.c.bf16 %v44_v41, %v43_v40  ;;  %v65_v45 = vpack.c.bf16 %v46_v43, %v45_v42  ;;  %v47_v46 = vld [vmem:[%s1364_s0 + $0xd0] sm:$0xff]  ;;  %v48_v47 = vld [vmem:[%s1364_s0 + $0xd8] sm:$0xff]  ;;  %v49_v48 = vld [vmem:[%s1364_s0 + $0xe0] sm:$0xff] }
   0xd   :  { %1056 = vmatpush3.bf16.msra.mxu1 %v1065_v19  ;;  %v50_v49 = vld [vmem:[%s1364_s0 + $0xe8] sm:$0xff]  ;;  %v66_v50 = vpack.c.bf16 %v48_v47, %v47_v46  ;;  %v51_v52 = vld [vmem:[%s1364_s0 + $0xf0] sm:$0xff]  ;;  %v52_v53 = vld [vmem:[%s1364_s0 + $0xf8] sm:$0xff] }
   0xe   :  { %972 = vmatmul.mubr.msk.bf16.gmra.mrb[4].mxu0 %vm84_vm0, %v56_v14  ;;  %1049 = vmatprep.subr.bf16.mxu1 %v1066_v22  ;;  %v67_v51 = vpack.c.bf16 %v50_v49, %v49_v48  ;;  %v68_v54 = vpack.c.bf16 %v52_v53, %v51_v52  ;;  %v1070_v55 = vld [vmem:[%s1365_s3 + $0x30] sm:$0xff]   ;;  %v1071_v56 = vld [vmem:[%s1365_s3 + $0x38] sm:$0xff]   ;;  %v1244_v57 = vld [vmem:[%s1366_s2] ss:$0 sm:$0xff] }
   0xf   :  { %975 = vmatprep.mubr.msk.bf16.mxu0 %vm84_vm0, %v57_v15  ;;  %1004 = vmatpush3.bf16.msra.mxu0 %v1066_v22 }
  0x10   :  { %1005 = vmatprep.subr.bf16.mxu0 %v1067_v25 }
  0x11   :  { %1057 = vmatpush3.bf16.msra.mxu1 %v1066_v22 }
  0x12   :  { %1050 = vmatprep.subr.bf16.mxu1 %v1067_v25 }
  0x13   :  { %1006 = vmatpush3.bf16.msra.mxu0 %v1067_v25 }
  0x14   :  { %1007 = vmatprep.subr.bf16.mxu0 %v1068_v30 }
  0x15   :  { %1058 = vmatpush3.bf16.msra.mxu1 %v1067_v25 }
  0x16   :  { %976 = vmatmul.mubr.msk.bf16.gmra.mrb[8].mxu0 %vm84_vm0, %v58_v23  ;;  %1051 = vmatprep.subr.bf16.mxu1 %v1068_v30 }
  0x17   :  { %979 = vmatprep.mubr.msk.bf16.mxu0 %vm84_vm0, %v59_v24  ;;  %1008 = vmatpush3.bf16.msra.mxu0 %v1068_v30 }
  0x18   :  { %1009 = vmatprep.subr.bf16.mxu0 %v1069_v33 }
  0x19   :  { %1059 = vmatpush3.bf16.msra.mxu1 %v1068_v30 }
  0x1a   :  { %1052 = vmatprep.subr.bf16.mxu1 %v1069_v33 }
  0x1b   :  { %1010 = vmatpush3.bf16.msra.mxu0 %v1069_v33 }
  0x1c   :  { %1011 = vmatprep.subr.bf16.mxu0 %v1070_v55 }
  0x1d   :  { %1060 = vmatpush3.bf16.msra.mxu1 %v1069_v33 }
  0x1e   :  { %980 = vmatmul.mubr.msk.bf16.gmra.mrb[12].mxu0 %vm84_vm0, %v60_v31  ;;  %1053 = vmatprep.subr.bf16.mxu1 %v1070_v55 }
  0x1f   :  { %983 = vmatprep.mubr.msk.bf16.mxu0 %vm84_vm0, %v61_v32  ;;  %1012 = vmatpush3.bf16.msra.mxu0 %v1070_v55 }
  0x20   :  { %1013 = vmatprep.subr.bf16.mxu0 %v1071_v56 }
  0x21   :  { %1061 = vmatpush3.bf16.msra.mxu1 %v1070_v55 }
  0x22   :  { %1054 = vmatprep.subr.bf16.mxu1 %v1071_v56 }
  0x23   :  { %1014 = vmatpush3.bf16.msra.mxu0 %v1071_v56 }
  0x25   :  { %1062 = vmatpush3.bf16.msra.mxu1 %v1071_v56 }
  0x26   :  { %984 = vmatmul.mubr.msk.bf16.gmra.mrb[16].mxu0 %vm84_vm0, %v62_v38 }
  0x27   :  { %987 = vmatprep.mubr.msk.bf16.mxu0 %vm84_vm0, %v63_v39 }
  0x2e   :  { %988 = vmatmul.mubr.msk.bf16.gmra.mrb[20].mxu0 %vm84_vm0, %v64_v44 }
  0x2f   :  { %991 = vmatprep.mubr.msk.bf16.mxu0 %vm84_vm0, %v65_v45 }
  0x36   :  { %992 = vmatmul.mubr.msk.bf16.gmra.mrb[24].mxu0 %vm84_vm0, %v66_v50 }
  0x37   :  { %995 = vmatprep.mubr.msk.bf16.mxu0 %vm84_vm0, %v67_v51 }
  0x3e   :  { %996 = vmatmul.mubr.msk.bf16.gmra.mrb[28].mxu0 %vm84_vm0, %v68_v54 }
  0xd9   :  { %v969_v58 = vpop.f32.mrb[0].mxu0 }
  0xda   :  { %v176_v59 = vadd.f32 %v969_v58, %v1244_v57  ;;  %v167_v60 = vpop.f32.mrb[1].mxu0 }
  0xdb   :  { %v168_v61 = vadd.f32 %v1244_v57, %v167_v60  ;;  %v970_v62 = vpop.f32.mrb[2].mxu0 }
  0xdc   :  { %v179_v63 = vadd.f32 %v970_v62, %v1244_v57  ;;  %v170_v0 = vpop.f32.mrb[3].mxu0  ;;  %v296_v2 = vmax.f32 %v176_v59, 0.0 }
  0xdd   :  { %v171_v1 = vadd.f32 %v1244_v57, %v170_v0  ;;  %v294_v4 = vmax.f32 %v168_v61, 0.0 }
  0xde   :  { %v297_v3 = vmax.f32 %v179_v63, 0.0 }
  0xdf   :  { %v295_v5 = vmax.f32 %v171_v1, 0.0 }
  0xe0   :  { %v327_v6 = vpack.c.bf16 %v297_v3, %v296_v2 }
  0xe1   :  { %v326_v7 = vpack.c.bf16 %v295_v5, %v294_v4  ;;  %v973_v8 = vpop.f32.mrb[4].mxu0 }
  0xe2   :  { %v192_v9 = vadd.f32 %v973_v8, %v1244_v57  ;;  %v183_v10 = vpop.f32.mrb[5].mxu0 }
  0xe3   :  { %v184_v11 = vadd.f32 %v1244_v57, %v183_v10  ;;  %v974_v12 = vpop.f32.mrb[6].mxu0  ;;  %1015 = vmatprep.mubr.bf16.mxu0 %v326_v7 }
  0xe4   :  { %v195_v13 = vadd.f32 %v974_v12, %v1244_v57  ;;  %v186_v14 = vpop.f32.mrb[7].mxu0  ;;  %1016 = vmatmul.mubr.bf16.vlgmr.msra.gmra.mrb[32].mxu0 %v327_v6  ;;  %v300_v16 = vmax.f32 %v192_v9, 0.0 }
  0xe5   :  { %v187_v15 = vadd.f32 %v1244_v57, %v186_v14  ;;  %v298_v18 = vmax.f32 %v184_v11, 0.0 }
  0xe6   :  { %v301_v17 = vmax.f32 %v195_v13, 0.0 }
  0xe7   :  { %v299_v19 = vmax.f32 %v187_v15, 0.0 }
  0xe8   :  { %v329_v20 = vpack.c.bf16 %v301_v17, %v300_v16 }
  0xe9   :  { %v977_v21 = vpop.f32.mrb[8].mxu0  ;;  %v328_v22 = vpack.c.bf16 %v299_v19, %v298_v18 }
  0xea   :  { %v208_v23 = vadd.f32 %v977_v21, %v1244_v57  ;;  %v199_v24 = vpop.f32.mrb[9].mxu0 }
  0xeb   :  { %v200_v25 = vadd.f32 %v1244_v57, %v199_v24  ;;  %v978_v26 = vpop.f32.mrb[10].mxu0  ;;  %1019 = vmatprep.mubr.bf16.mxu1 %v328_v22 }
  0xec   :  { %v211_v27 = vadd.f32 %v978_v26, %v1244_v57  ;;  %v202_v28 = vpop.f32.mrb[11].mxu0  ;;  %1020 = vmatmul.mubr.bf16.vlgmr.msra.gmra.mrb[0].mxu1 %v329_v20  ;;  %v304_v30 = vmax.f32 %v208_v23, 0.0 }
  0xed   :  { %v203_v29 = vadd.f32 %v1244_v57, %v202_v28  ;;  %v302_v32 = vmax.f32 %v200_v25, 0.0 }
  0xee   :  { %v305_v31 = vmax.f32 %v211_v27, 0.0 }
  0xef   :  { %v303_v33 = vmax.f32 %v203_v29, 0.0 }
  0xf0   :  { %v331_v34 = vpack.c.bf16 %v305_v31, %v304_v30 }
  0xf1   :  { %v330_v35 = vpack.c.bf16 %v303_v33, %v302_v32  ;;  %v981_v36 = vpop.f32.mrb[12].mxu0 }
  0xf2   :  { %v224_v37 = vadd.f32 %v981_v36, %v1244_v57  ;;  %v215_v38 = vpop.f32.mrb[13].mxu0 }
  0xf3   :  { %v216_v39 = vadd.f32 %v1244_v57, %v215_v38  ;;  %v982_v40 = vpop.f32.mrb[14].mxu0  ;;  %1023 = vmatprep.mubr.bf16.mxu1 %v330_v35 }
  0xf4   :  { %v227_v41 = vadd.f32 %v982_v40, %v1244_v57  ;;  %v218_v42 = vpop.f32.mrb[15].mxu0  ;;  %1024 = vmatmul.mubr.bf16.gmra.mrb[4].mxu1 %v331_v34  ;;  %v308_v44 = vmax.f32 %v224_v37, 0.0 }
  0xf5   :  { %v219_v43 = vadd.f32 %v1244_v57, %v218_v42  ;;  %v306_v46 = vmax.f32 %v216_v39, 0.0 }
  0xf6   :  { %v309_v45 = vmax.f32 %v227_v41, 0.0 }
  0xf7   :  { %v307_v47 = vmax.f32 %v219_v43, 0.0 }
  0xf8   :  { %v333_v48 = vpack.c.bf16 %v309_v45, %v308_v44  ;;  %v1281_v44 = vld [vmem:[%s1367_s4] ss:$0 sm:$0xff] }
  0xf9   :  { %v332_v49 = vpack.c.bf16 %v307_v47, %v306_v46  ;;  %v985_v50 = vpop.f32.mrb[16].mxu0 }
  0xfa   :  { %v240_v51 = vadd.f32 %v985_v50, %v1244_v57  ;;  %v231_v52 = vpop.f32.mrb[17].mxu0 }
  0xfb   :  { %v232_v53 = vadd.f32 %v1244_v57, %v231_v52  ;;  %v986_v54 = vpop.f32.mrb[18].mxu0  ;;  %1027 = vmatprep.mubr.bf16.mxu1 %v332_v49 }
  0xfc   :  { %v243_v55 = vadd.f32 %v986_v54, %v1244_v57  ;;  %v234_v56 = vpop.f32.mrb[19].mxu0  ;;  %1028 = vmatmul.mubr.bf16.gmra.mrb[8].mxu1 %v333_v48  ;;  %v312_v59 = vmax.f32 %v240_v51, 0.0 }
  0xfd   :  { %v235_v58 = vadd.f32 %v1244_v57, %v234_v56  ;;  %v310_v61 = vmax.f32 %v232_v53, 0.0 }
  0xfe   :  { %v313_v60 = vmax.f32 %v243_v55, 0.0 }
  0xff   :  { %v311_v62 = vmax.f32 %v235_v58, 0.0 }
 0x100   :  { %v335_v63 = vpack.c.bf16 %v313_v60, %v312_v59 }
 0x101   :  { %v334_v0 = vpack.c.bf16 %v311_v62, %v310_v61  ;;  %v989_v1 = vpop.f32.mrb[20].mxu0 }
 0x102   :  { %v256_v2 = vadd.f32 %v989_v1, %v1244_v57  ;;  %v247_v3 = vpop.f32.mrb[21].mxu0 }
 0x103   :  { %v248_v4 = vadd.f32 %v1244_v57, %v247_v3  ;;  %v990_v5 = vpop.f32.mrb[22].mxu0  ;;  %1031 = vmatprep.mubr.bf16.mxu1 %v334_v0 }
 0x104   :  { %v259_v6 = vadd.f32 %v990_v5, %v1244_v57  ;;  %v250_v7 = vpop.f32.mrb[23].mxu0  ;;  %1032 = vmatmul.mubr.bf16.gmra.mrb[12].mxu1 %v335_v63  ;;  %v316_v9 = vmax.f32 %v256_v2, 0.0 }
 0x105   :  { %v251_v8 = vadd.f32 %v1244_v57, %v250_v7  ;;  %v314_v11 = vmax.f32 %v248_v4, 0.0 }
 0x106   :  { %v317_v10 = vmax.f32 %v259_v6, 0.0 }
 0x107   :  { %v315_v12 = vmax.f32 %v251_v8, 0.0 }
 0x108   :  { %v337_v13 = vpack.c.bf16 %v317_v10, %v316_v9 }
 0x109   :  { %v336_v14 = vpack.c.bf16 %v315_v12, %v314_v11  ;;  %v993_v15 = vpop.f32.mrb[24].mxu0 }
 0x10a   :  { %v272_v16 = vadd.f32 %v993_v15, %v1244_v57  ;;  %v263_v17 = vpop.f32.mrb[25].mxu0 }
 0x10b   :  { %v264_v18 = vadd.f32 %v1244_v57, %v263_v17  ;;  %v994_v19 = vpop.f32.mrb[26].mxu0  ;;  %1035 = vmatprep.mubr.bf16.mxu1 %v336_v14 }
 0x10c   :  { %v275_v20 = vadd.f32 %v994_v19, %v1244_v57  ;;  %v266_v21 = vpop.f32.mrb[27].mxu0  ;;  %1036 = vmatmul.mubr.bf16.gmra.mrb[16].mxu1 %v337_v13  ;;  %v320_v23 = vmax.f32 %v272_v16, 0.0 }
 0x10d   :  { %v267_v22 = vadd.f32 %v1244_v57, %v266_v21  ;;  %v318_v25 = vmax.f32 %v264_v18, 0.0 }
 0x10e   :  { %v321_v24 = vmax.f32 %v275_v20, 0.0 }
 0x10f   :  { %v319_v26 = vmax.f32 %v267_v22, 0.0 }
 0x110   :  { %v339_v27 = vpack.c.bf16 %v321_v24, %v320_v23 }
 0x111   :  { %v338_v28 = vpack.c.bf16 %v319_v26, %v318_v25  ;;  %v997_v29 = vpop.f32.mrb[28].mxu0 }
 0x112   :  { %v288_v30 = vadd.f32 %v997_v29, %v1244_v57  ;;  %v279_v31 = vpop.f32.mrb[29].mxu0 }
 0x113   :  { %v280_v32 = vadd.f32 %v1244_v57, %v279_v31  ;;  %v998_v33 = vpop.f32.mrb[30].mxu0  ;;  %1039 = vmatprep.mubr.bf16.mxu1 %v338_v28 }
 0x114   :  { %v291_v34 = vadd.f32 %v998_v33, %v1244_v57  ;;  %v282_v35 = vpop.f32.mrb[31].mxu0  ;;  %1040 = vmatmul.mubr.bf16.gmra.mrb[20].mxu1 %v339_v27  ;;  %v324_v37 = vmax.f32 %v288_v30, 0.0 }
 0x115   :  { %v283_v36 = vadd.f32 %v1244_v57, %v282_v35  ;;  %v322_v39 = vmax.f32 %v280_v32, 0.0 }
 0x116   :  { %v325_v38 = vmax.f32 %v291_v34, 0.0 }
 0x117   :  { %v323_v40 = vmax.f32 %v283_v36, 0.0 }
 0x118   :  { %v341_v41 = vpack.c.bf16 %v325_v38, %v324_v37 }
 0x119   :  { %v340_v42 = vpack.c.bf16 %v323_v40, %v322_v39 }
 0x11b   :  { %1043 = vmatprep.mubr.bf16.mxu1 %v340_v42 }
 0x11c   :  { %1044 = vmatmul.mubr.bf16.gmra.mrb[24].mxu1 %v341_v41 }
 0x1b7   :  { %v1017_v43 = vpop.f32.mrb[32].mxu0 }
 0x1b8   :  { %v447_v45 = vpop.f32.mrb[33].mxu0  ;;  %v456_v47 = vadd.f32 %v1017_v43, %v1281_v44 }
 0x1b9   :  { %v1018_v46 = vpop.f32.mrb[34].mxu0  ;;  %v448_v49 = vadd.f32 %v1281_v44, %v447_v45 }
 0x1ba   :  { %v459_v57 = vadd.f32 %v1018_v46, %v1281_v44  ;;  %v450_v48 = vpop.f32.mrb[35].mxu0 }
 0x1bb   :  { %v451_v50 = vadd.f32 %v1281_v44, %v450_v48 }
 0x1bc   :  { %v837_v51 = vpack.c.bf16 %v459_v57, %v456_v47 }
 0x1bd   :  { %v832_v52 = vpack.c.bf16 %v451_v50, %v448_v49 }
 0x1be   :  { %909 = vst [vmem:[%s1368_s5 + $0x8] sm:$0xff] %v837_v51  }
 0x1bf   :  { %833 = vst [vmem:[%s1368_s5] sm:$0xff] %v832_v52   ;;  %v1021_v53 = vpop.f32.mrb[0].mxu1 }
 0x1c0   :  { %v463_v54 = vpop.f32.mrb[1].mxu1  ;;  %v472_v56 = vadd.f32 %v1021_v53, %v1281_v44 }
 0x1c1   :  { %v1022_v55 = vpop.f32.mrb[2].mxu1  ;;  %v464_v60 = vadd.f32 %v1281_v44, %v463_v54 }
 0x1c2   :  { %v475_v58 = vadd.f32 %v1022_v55, %v1281_v44  ;;  %v466_v59 = vpop.f32.mrb[3].mxu1 }
 0x1c3   :  { %v467_v61 = vadd.f32 %v1281_v44, %v466_v59 }
 0x1c4   :  { %v847_v62 = vpack.c.bf16 %v475_v58, %v472_v56 }
 0x1c5   :  { %v842_v63 = vpack.c.bf16 %v467_v61, %v464_v60 }
 0x1c6   :  { %911 = vst [vmem:[%s1368_s5 + $0x18] sm:$0xff] %v847_v62  }
 0x1c7   :  { %910 = vst [vmem:[%s1368_s5 + $0x10] sm:$0xff] %v842_v63   ;;  %v1025_v0 = vpop.f32.mrb[4].mxu1 }
 0x1c8   :  { %v479_v1 = vpop.f32.mrb[5].mxu1  ;;  %v488_v3 = vadd.f32 %v1025_v0, %v1281_v44 }
 0x1c9   :  { %v1026_v2 = vpop.f32.mrb[6].mxu1  ;;  %v480_v6 = vadd.f32 %v1281_v44, %v479_v1 }
 0x1ca   :  { %v491_v4 = vadd.f32 %v1026_v2, %v1281_v44  ;;  %v482_v5 = vpop.f32.mrb[7].mxu1 }
 0x1cb   :  { %v483_v7 = vadd.f32 %v1281_v44, %v482_v5 }
 0x1cc   :  { %v857_v8 = vpack.c.bf16 %v491_v4, %v488_v3 }
 0x1cd   :  { %v852_v9 = vpack.c.bf16 %v483_v7, %v480_v6 }
 0x1ce   :  { %913 = vst [vmem:[%s1368_s5 + $0x28] sm:$0xff] %v857_v8  }
 0x1cf   :  { %912 = vst [vmem:[%s1368_s5 + $0x20] sm:$0xff] %v852_v9   ;;  %v1029_v10 = vpop.f32.mrb[8].mxu1 }
 0x1d0   :  { %v495_v11 = vpop.f32.mrb[9].mxu1  ;;  %v504_v13 = vadd.f32 %v1029_v10, %v1281_v44 }
 0x1d1   :  { %v1030_v12 = vpop.f32.mrb[10].mxu1  ;;  %v496_v16 = vadd.f32 %v1281_v44, %v495_v11 }
 0x1d2   :  { %v507_v14 = vadd.f32 %v1030_v12, %v1281_v44  ;;  %v498_v15 = vpop.f32.mrb[11].mxu1 }
 0x1d3   :  { %v499_v17 = vadd.f32 %v1281_v44, %v498_v15 }
 0x1d4   :  { %v867_v18 = vpack.c.bf16 %v507_v14, %v504_v13 }
 0x1d5   :  { %v862_v19 = vpack.c.bf16 %v499_v17, %v496_v16 }
 0x1d6   :  { %915 = vst [vmem:[%s1368_s5 + $0x38] sm:$0xff] %v867_v18  }
 0x1d7   :  { %914 = vst [vmem:[%s1368_s5 + $0x30] sm:$0xff] %v862_v19   ;;  %v1033_v20 = vpop.f32.mrb[12].mxu1 }
 0x1d8   :  { %v511_v21 = vpop.f32.mrb[13].mxu1  ;;  %v520_v23 = vadd.f32 %v1033_v20, %v1281_v44 }
 0x1d9   :  { %v1034_v22 = vpop.f32.mrb[14].mxu1  ;;  %v512_v26 = vadd.f32 %v1281_v44, %v511_v21 }
 0x1da   :  { %v523_v24 = vadd.f32 %v1034_v22, %v1281_v44  ;;  %v514_v25 = vpop.f32.mrb[15].mxu1 }
 0x1db   :  { %v515_v27 = vadd.f32 %v1281_v44, %v514_v25 }
 0x1dc   :  { %v877_v28 = vpack.c.bf16 %v523_v24, %v520_v23 }
 0x1dd   :  { %v872_v29 = vpack.c.bf16 %v515_v27, %v512_v26 }
 0x1de   :  { %917 = vst [vmem:[%s1368_s5 + $0x48] sm:$0xff] %v877_v28  }
 0x1df   :  { %916 = vst [vmem:[%s1368_s5 + $0x40] sm:$0xff] %v872_v29   ;;  %v1037_v30 = vpop.f32.mrb[16].mxu1 }
 0x1e0   :  { %v527_v31 = vpop.f32.mrb[17].mxu1  ;;  %v536_v33 = vadd.f32 %v1037_v30, %v1281_v44 }
 0x1e1   :  { %v1038_v32 = vpop.f32.mrb[18].mxu1  ;;  %v528_v36 = vadd.f32 %v1281_v44, %v527_v31 }
 0x1e2   :  { %v539_v34 = vadd.f32 %v1038_v32, %v1281_v44  ;;  %v530_v35 = vpop.f32.mrb[19].mxu1 }
 0x1e3   :  { %v531_v37 = vadd.f32 %v1281_v44, %v530_v35 }
 0x1e4   :  { %v887_v38 = vpack.c.bf16 %v539_v34, %v536_v33 }
 0x1e5   :  { %v882_v39 = vpack.c.bf16 %v531_v37, %v528_v36 }
 0x1e6   :  { %919 = vst [vmem:[%s1368_s5 + $0x58] sm:$0xff] %v887_v38  }
 0x1e7   :  { %918 = vst [vmem:[%s1368_s5 + $0x50] sm:$0xff] %v882_v39   ;;  %v1041_v40 = vpop.f32.mrb[20].mxu1 }
 0x1e8   :  { %v543_v41 = vpop.f32.mrb[21].mxu1  ;;  %v552_v43 = vadd.f32 %v1041_v40, %v1281_v44 }
 0x1e9   :  { %v1042_v42 = vpop.f32.mrb[22].mxu1  ;;  %v544_v47 = vadd.f32 %v1281_v44, %v543_v41 }
 0x1ea   :  { %v555_v45 = vadd.f32 %v1042_v42, %v1281_v44  ;;  %v546_v46 = vpop.f32.mrb[23].mxu1 }
 0x1eb   :  { %v547_v57 = vadd.f32 %v1281_v44, %v546_v46 }
 0x1ec   :  { %v897_v48 = vpack.c.bf16 %v555_v45, %v552_v43 }
 0x1ed   :  { %v892_v49 = vpack.c.bf16 %v547_v57, %v544_v47 }
 0x1ee   :  { %921 = vst [vmem:[%s1368_s5 + $0x68] sm:$0xff] %v897_v48  }
 0x1ef   :  { %920 = vst [vmem:[%s1368_s5 + $0x60] sm:$0xff] %v892_v49   ;;  %v1045_v50 = vpop.f32.mrb[24].mxu1 }
 0x1f0   :  { %v559_v51 = vpop.f32.mrb[25].mxu1  ;;  %v568_v53 = vadd.f32 %v1045_v50, %v1281_v44 }
 0x1f1   :  { %v1046_v52 = vpop.f32.mrb[26].mxu1  ;;  %v560_v56 = vadd.f32 %v1281_v44, %v559_v51 }
 0x1f2   :  { %v571_v54 = vadd.f32 %v1046_v52, %v1281_v44  ;;  %v562_v55 = vpop.f32.mrb[27].mxu1 }
 0x1f3   :  { %v563_v58 = vadd.f32 %v1281_v44, %v562_v55 }
 0x1f4   :  { %v907_v59 = vpack.c.bf16 %v571_v54, %v568_v53 }
 0x1f5   :  { %v902_v60 = vpack.c.bf16 %v563_v58, %v560_v56 }
 0x1f6   :  { %923 = vst [vmem:[%s1368_s5 + $0x78] sm:$0xff] %v907_v59  }
 0x1f7   :  { %922 = vst [vmem:[%s1368_s5 + $0x70] sm:$0xff] %v902_v60  }

</bundles_post_ra>
